<compile_context>
chip_gen: v7x
topology: tpu7x:2x2x1
jax: 0.10.0
libtpu: 0.0.40
codegen_flags: <defaults>
</compile_context>

<pallas_src>
import functools
import math

import jax
import jax.numpy as jnp
from jax.experimental import pallas as pl
from jax.experimental.pallas import tpu as pltpu


# ----------------------------- Pallas kernel ---------------------------------

def _layernorm_kernel(x_ref, a_ref, b_ref, o_ref, *, eps):
    # x_ref: (block_rows, feat)   a_ref/b_ref: (1, feat) f32   o_ref: (block_rows, feat)
    x = x_ref[...].astype(jnp.float32)
    feat = x.shape[-1]
    mean = jnp.mean(x, axis=-1, keepdims=True)
    xc = x - mean
    # torch.std default is the unbiased estimator (ddof=1).  Guard feat==1 only
    # against a trace-time ZeroDivisionError (torch would return NaN there).
    inv_denom = jnp.float32(1.0 / max(feat - 1, 1))
    var = jnp.sum(xc * xc, axis=-1, keepdims=True) * inv_denom
    std = jnp.sqrt(var)
    # Exact reciprocal still runs on the EUP slot (free next to the VALU work);
    # exact keeps the 1e-5 allclose contract rock solid.
    inv = pl.reciprocal(std + jnp.float32(eps), approx=False)
    y = a_ref[...] * (xc * inv) + b_ref[...]
    o_ref[...] = y.astype(o_ref.dtype)


# ----------------------------- wrapper ----------------------------------------

# Per-block f32-equivalent budget (covers the in-kernel f32 temporaries) and the
# scoped VMEM limit handed to Mosaic.  2 arrays x 2 buffers x 8 MiB = 32 MiB
# resident, comfortably under 48 MiB scoped / 64 MiB physical (v7x).
_BLOCK_F32_BYTES_BUDGET = 8 * 1024 * 1024
_VMEM_LIMIT_BYTES = 48 * 1024 * 1024


def _pick_block_rows(rows, feat, itemsize, requested):
    # sublane tile: 8 for 4-byte, 16 for 2-byte, 32 for 1-byte dtypes
    sublane = max(8, 32 // max(1, itemsize))
    eff_itemsize = max(itemsize, 4)          # kernel computes in f32
    max_rows_by_vmem = max(sublane, _BLOCK_F32_BYTES_BUDGET // (feat * eff_itemsize))
    br = min(requested, max_rows_by_vmem)
    # no point in a block taller than all rows (rounded up to the sublane tile)
    br = min(br, ((rows + sublane - 1) // sublane) * sublane)
    # round down to a sublane-tile multiple
    br = max(sublane, (br // sublane) * sublane)
    return br


def layernorm_pallas(x, a_2, b_2, eps=1e-6, block_rows=512):
    """LayerNorm over the last axis of x (any leading shape), Pallas TPU kernel.

    `block_rows` is a sweep parameter (256-1024 typical); it is automatically
    clamped to the VMEM budget, the row count, and the dtype sublane tile.
    """
    orig_shape = x.shape
    feat = orig_shape[-1]
    rows = math.prod(orig_shape[:-1]) if len(orig_shape) > 1 else 1
    x2 = x.reshape(rows, feat)
    itemsize = jnp.dtype(x.dtype).itemsize

    br = _pick_block_rows(rows, feat, itemsize, block_rows)
    grid = (pl.cdiv(rows, br),)  # partial last block handled by masked writes

    # Pre-cast scale/bias to the compute dtype once, outside the kernel.
    a2 = a_2.astype(jnp.float32).reshape(1, feat)
    b2 = b_2.astype(jnp.float32).reshape(1, feat)

    # The feature (last) dim is the lane axis.  For transformer widths that are
    # multiples of 128 this gives fully dense vst; for tiny feat (demo's 32) the
    # stores are masked but correct.
    # TODO(synk): for production shapes with feat not a multiple of 128, repack
    # several rows per lane slab (segmented lane reduction) for dense stores.

    kernel = functools.partial(_layernorm_kernel, eps=eps)

    out = pl.pallas_call(
        kernel,
        out_shape=jax.ShapeDtypeStruct((rows, feat), x.dtype),
        grid_spec=pltpu.PrefetchScalarGridSpec(
            num_scalar_prefetch=0,
            grid=grid,
            in_specs=[
                pl.BlockSpec((br, feat), lambda i: (i, 0)),
                pl.BlockSpec((1, feat), lambda i: (0, 0)),
                pl.BlockSpec((1, feat), lambda i: (0, 0)),
            ],
            out_specs=pl.BlockSpec((br, feat), lambda i: (i, 0)),
        ),
        compiler_params=pltpu.CompilerParams(
            dimension_semantics=("parallel",),   # shards row blocks across TCs
            vmem_limit_bytes=_VMEM_LIMIT_BYTES,
        ),
    )(x2, a2, b2)

    return out.reshape(orig_shape)


# ----------------------------- module wrapper ----------------------------------

class LayerNorm:
    """Matches the PyTorch module: a_2 = ones(features), b_2 = zeros(features)."""

    def __init__(self, features, eps=1e-6):
        self.a_2 = jnp.ones((features,), dtype=jnp.float32)
        self.b_2 = jnp.zeros((features,), dtype=jnp.float32)
        self.eps = eps

    def __call__(self, x):
        return layernorm_pallas(x, self.a_2, self.b_2, eps=self.eps)


# ----------------------------- demo / check ------------------------------------

def _layernorm_ref(x, a_2, b_2, eps):
    # torch-matching semantics: ddof=1 std, eps added to std
    mean = jnp.mean(x, axis=-1, keepdims=True)
    var = jnp.sum((x - mean) ** 2, axis=-1, keepdims=True) / (x.shape[-1] - 1)
    std = jnp.sqrt(var)
    return a_2 * (x - mean) / (std + eps) + b_2


if __name__ == "__main__":
    key = jax.random.PRNGKey(0)
    B, S, D = 2, 8, 32   # batch, seq, features

    kx, ka, kb, kx2 = jax.random.split(key, 4)
    x = jax.random.normal(kx, (B, S, D), dtype=jnp.float32)

    # 1) Module-style call (a_2 = ones, b_2 = zeros), default block sizing.
    ln = LayerNorm(D, eps=1e-6)
    out = jax.block_until_ready(ln(x))
    ref = _layernorm_ref(x, ln.a_2, ln.b_2, ln.eps)
    assert out.shape == (B, S, D)
    assert jnp.allclose(out, ref, atol=1e-5, rtol=1e-5), "mismatch vs reference (module call)"

    # 2) Non-trivial scale/bias.
    a_2 = jax.random.normal(ka, (D,), dtype=jnp.float32)
    b_2 = jax.random.normal(kb, (D,), dtype=jnp.float32)
    out2 = jax.block_until_ready(layernorm_pallas(x, a_2, b_2, eps=1e-6))
    ref2 = _layernorm_ref(x, a_2, b_2, 1e-6)
    assert jnp.allclose(out2, ref2, atol=1e-5, rtol=1e-5), "mismatch vs reference (scale/bias)"

    # 3) Rows not a multiple of block_rows -> exercises the masked partial block
    #    (no jnp.pad / slice round trip in the wrapper).
    x3 = jax.random.normal(kx2, (2, 9, D), dtype=jnp.float32)   # rows = 18
    out3 = jax.block_until_ready(layernorm_pallas(x3, a_2, b_2, eps=1e-6, block_rows=8))
    ref3 = _layernorm_ref(x3, a_2, b_2, 1e-6)
    assert jnp.allclose(out3, ref3, atol=1e-5, rtol=1e-5), "mismatch vs reference (partial block)"

    print("KERNEL_OK")
</pallas_src>

<mosaic_0001>
module attributes {stable_mosaic.version = 11 : i64} {
  func.func @_layernorm_kernel(%arg0: i32, %arg1: memref<16x32xf32, #tpu.memory_space<vmem>>, %arg2: memref<1x32xf32, #tpu.memory_space<vmem>>, %arg3: memref<1x32xf32, #tpu.memory_space<vmem>>, %arg4: memref<16x32xf32, #tpu.memory_space<vmem>>) attributes {dimension_semantics = [#tpu.dimension_semantics<parallel>], iteration_bounds = array<i64: 1>, scalar_prefetch = 0 : i64, scratch_operands = 0 : i64, tpu.core_type = #tpu.core_type<tc>, window_params = [{transform_indices = @transform_0, window_bounds = array<i64: 16, 32>}, {pipeline_mode = #tpu.pipeline_mode<synchronous>, transform_indices = @transform_1, window_bounds = array<i64: 1, 32>}, {pipeline_mode = #tpu.pipeline_mode<synchronous>, transform_indices = @transform_2, window_bounds = array<i64: 1, 32>}, {transform_indices = @transform_3, window_bounds = array<i64: 16, 32>}]} {
    %c0 = arith.constant 0 : index
    %c0_0 = arith.constant 0 : index
    %0 = vector.load %arg1[%c0, %c0_0] : memref<16x32xf32, #tpu.memory_space<vmem>>, vector<16x32xf32>
    %cst = arith.constant dense<0.000000e+00> : vector<16xf32>
    %1 = vector.multi_reduction <add>, %0, %cst [1] : vector<16x32xf32> to vector<16xf32>
    %2 = vector.shape_cast %1 : vector<16xf32> to vector<16x1xf32>
    %cst_1 = arith.constant 3.200000e+01 : f32
    %3 = vector.broadcast %cst_1 : f32 to vector<16x1xf32>
    %4 = arith.divf %2, %3 : vector<16x1xf32>
    %5 = vector.broadcast %4 : vector<16x1xf32> to vector<16x32xf32>
    %6 = arith.subf %0, %5 : vector<16x32xf32>
    %7 = arith.mulf %6, %6 : vector<16x32xf32>
    %cst_2 = arith.constant dense<0.000000e+00> : vector<16xf32>
    %8 = vector.multi_reduction <add>, %7, %cst_2 [1] : vector<16x32xf32> to vector<16xf32>
    %9 = vector.shape_cast %8 : vector<16xf32> to vector<16x1xf32>
    %cst_3 = arith.constant 0.0322580636 : f32
    %10 = vector.broadcast %cst_3 : f32 to vector<16x1xf32>
    %11 = arith.mulf %9, %10 : vector<16x1xf32>
    %12 = math.sqrt %11 : vector<16x1xf32>
    %cst_4 = arith.constant 9.99999997E-7 : f32
    %13 = vector.broadcast %cst_4 : f32 to vector<16x1xf32>
    %14 = arith.addf %12, %13 : vector<16x1xf32>
    %15 = tpu.reciprocal %14 : vector<16x1xf32> -> vector<16x1xf32>
    %c0_5 = arith.constant 0 : index
    %c0_6 = arith.constant 0 : index
    %16 = vector.load %arg2[%c0_5, %c0_6] : memref<1x32xf32, #tpu.memory_space<vmem>>, vector<1x32xf32>
    %17 = vector.broadcast %15 : vector<16x1xf32> to vector<16x32xf32>
    %18 = arith.mulf %6, %17 : vector<16x32xf32>
    %19 = vector.broadcast %16 : vector<1x32xf32> to vector<16x32xf32>
    %20 = arith.mulf %19, %18 : vector<16x32xf32>
    %c0_7 = arith.constant 0 : index
    %c0_8 = arith.constant 0 : index
    %21 = vector.load %arg3[%c0_7, %c0_8] : memref<1x32xf32, #tpu.memory_space<vmem>>, vector<1x32xf32>
    %22 = vector.broadcast %21 : vector<1x32xf32> to vector<16x32xf32>
    %23 = arith.addf %20, %22 : vector<16x32xf32>
    %c0_9 = arith.constant 0 : index
    %c0_10 = arith.constant 0 : index
    %24 = vector.load %arg4[%c0_9, %c0_10] : memref<16x32xf32, #tpu.memory_space<vmem>>, vector<16x32xf32>
    tpu.vector_store %arg4[%c0_9, %c0_10], %23 {strides = array<i32>} : memref<16x32xf32, #tpu.memory_space<vmem>>, vector<16x32xf32>,
    return
  }
  func.func @transform_0(%arg0: i32) -> (i32, i32) {
    %c0_i32 = arith.constant 0 : i32
    %c0_i32_0 = arith.constant 0 : i32
    return %arg0, %c0_i32 : i32, i32
  }
  func.func @transform_1(%arg0: i32) -> (i32, i32) {
    %c0_i32 = arith.constant 0 : i32
    %c0_i32_0 = arith.constant 0 : i32
    %c0_i32_1 = arith.constant 0 : i32
    return %c0_i32, %c0_i32_0 : i32, i32
  }
  func.func @transform_2(%arg0: i32) -> (i32, i32) {
    %c0_i32 = arith.constant 0 : i32
    %c0_i32_0 = arith.constant 0 : i32
    %c0_i32_1 = arith.constant 0 : i32
    return %c0_i32, %c0_i32_0 : i32, i32
  }
  func.func @transform_3(%arg0: i32) -> (i32, i32) {
    %c0_i32 = arith.constant 0 : i32
    %c0_i32_0 = arith.constant 0 : i32
    return %arg0, %c0_i32 : i32, i32
  }
}

</mosaic_0001>

<bundles_post_ra>
// kernel: tpu_custom_call.1
= control target key start
LH: loop header
LB: loop body
LE: loop exit
PB: predicated region body
PF: predicated region fallthrough
CT: control target
= control target key end

     0   :  { %8 = vsyncpa [#allocation3], 0  ;;  %s238_s0 = inlined_call_operand.hbm [shape: f32[16,32], index: 0, kind: input, shape index: {}]   ;;  %s239_s1 = inlined_call_operand.vmem [shape: f32[1,32], index: 1, kind: input, shape index: {}]   ;;  %s240_s2 = inlined_call_operand.vmem [shape: f32[1,32], index: 2, kind: input, shape index: {}]   ;;  %s241_s3 = inlined_call_operand.hbm [shape: f32[16,32], index: 3, kind: output, shape index: {}]  }
   0x1   :  { %9 = vsyncpa [#allocation4], 0  ;;  %s172_s12 = smov [#allocation2]   ;;  %s124_s16 = scalar_lea.hbm %s238_s0, 256 }
   0x2   :  { %s15_s13 = sshll.u32 %s172_s12, 4  ;;  %p125_p0 = scmp.ne.s32.totalorder %s238_s0, %s124_s16  ;;  %s16_s13 = int_to_ptr.vmem [resolvable:$true] %s15_s13 }
   0x3   :  { %p128_p1 = scmp.lt.u32.totalorder %s124_s16, %s238_s0 }
   0x5   :  { %p130_p2 = pnand %p128_p1, %p125_p0 }
   0x7   :  { %133 = shalt.err (!%p130_p2)
}
   0x8   :  { %s134_s21 = scalar_lea.vmem %s16_s13, 256  ;;  %p139_p4 = scmp.lt.s32.totalorder %s16_s13, %s16_s13 }
   0x9   :  { %p135_p3 = scmp.ne.s32.totalorder %s16_s13, %s134_s21  ;;  %p140_p5 = scmp.lt.s32.totalorder %s134_s21, %s134_s21 }
   0xb   :  { %p141_p6 = por %p140_p5, %p139_p4 }
   0xd   :  { %p142_p7 = pnand %p141_p6, %p135_p3 }
   0xf   :  { %145 = shalt.err (!%p142_p7)
}
  0x10   :  { %s173_s22 = smov 128   ;;  %s174_s23 = smov 8  }
  0x11   :  { %21 = dma.hbm_to_vmem [thread:$0]  %s238_s0, 256, %s16_s13, [#allocation3], %s173_s22, %s173_s22, %s174_s23  }
  0x12   :  { %168 = dma.done.wait [#allocation3], 256  }
  0x13   :  { %169 = vsyncadd [#allocation3], 4294967040  ;;  %vm31_vm0 = vcmask 261120   ;;  %v29_v0 = vld [vmem:[#allocation2] sm:$0xff]  ;;  %v30_v1 = vld [vmem:[#allocation2 + $0x8] sm:$0xff]  ;;  %s175_s29 = smov [#allocation5]  }
  0x14   :  { %v32_v2 = vsel %vm31_vm0, %v29_v0, 0.0  ;;  %v35_v3 = vsel %vm31_vm0, %v30_v1, 0.0  ;;  %v110_v31 = vld [vmem:[%s239_s1] ss:$0 sm:$0xff]  ;;  %s98_s30 = sshll.u32 %s175_s29, 4  ;;  %s99_s30 = int_to_ptr.vmem [resolvable:$true] %s98_s30 }
  0x15   :  { %33 = vadd.xlane.f32.xlu0 %v32_v2  ;;  %v111_v33 = vld [vmem:[%s240_s2] ss:$0 sm:$0xff]  ;;  %s146_s4 = scalar_lea.vmem %s99_s30, 256  ;;  %p151_p9 = scmp.lt.s32.totalorder %s99_s30, %s99_s30 }
  0x16   :  { %p147_p8 = scmp.ne.s32.totalorder %s99_s30, %s146_s4  ;;  %p152_p10 = scmp.lt.s32.totalorder %s146_s4, %s146_s4 }
  0x18   :  { %p153_p11 = por %p152_p10, %p151_p9 }
  0x19   :  { %36 = vadd.xlane.f32.xlu0 %v35_v3 }
  0x1a   :  { %p154_p12 = pnand %p153_p11, %p147_p8 }
  0xa2   :  { %v34_v4 = vpop.xlane.xlu0 %33 }
  0xa3   :  { %v39_v5 = vmul.f32 0.03125, %v34_v4 }
  0xa5   :  { %v41_v6 = vsub.f32 %v29_v0, %v39_v5 }
  0xa6   :  { %v37_v7 = vpop.xlane.xlu0 %36 }
  0xa7   :  { %v40_v8 = vmul.f32 0.03125, %v37_v7  ;;  %v43_v9 = vmul.f32 %v41_v6, %v41_v6 }
  0xa9   :  { %v42_v10 = vsub.f32 %v30_v1, %v40_v8  ;;  %v45_v11 = vsel %vm31_vm0, %v43_v9, 0.0 }
  0xaa   :  { %46 = vadd.xlane.f32.xlu1 %v45_v11 }
  0xab   :  { %v44_v12 = vmul.f32 %v42_v10, %v42_v10 }
  0xad   :  { %v48_v13 = vsel %vm31_vm0, %v44_v12, 0.0 }
  0xae   :  { %49 = vadd.xlane.f32.xlu1 %v48_v13 }
 0x137   :  { %v47_v14 = vpop.xlane.xlu1 %46 }
 0x138   :  { %v51_v15 = vmul.f32 0.032258064, %v47_v14 }
 0x13a   :  { %116 = vrsqrt.f32 %v51_v15  ;;  %vm55_vm1 = vcmp.eq.f32.partialorder %v51_v15, inf  ;;  %v58_v20 = vand.u32 2147483648, %v51_v15  ;;  %vm57_vm2 = vcmp.eq.f32.partialorder %v51_v15, 0.0 }
 0x13b   :  { %v50_v16 = vpop.xlane.xlu1 %49 }
 0x13c   :  { %v52_v17 = vmul.f32 0.032258064, %v50_v16 }
 0x13e   :  { %118 = vrsqrt.f32 %v52_v17  ;;  %vm62_vm3 = vcmp.eq.f32.partialorder %v52_v17, inf  ;;  %v65_v26 = vand.u32 2147483648, %v52_v17  ;;  %vm64_vm4 = vcmp.eq.f32.partialorder %v52_v17, 0.0 }
 0x144   :  { %v117_v18 = vpop.eup %116 }
 0x145   :  { %v54_v19 = vmul.f32 %v117_v18, %v51_v15 }
 0x147   :  { %v56_v21 = vsel %vm55_vm1, %v51_v15, %v54_v19 }
 0x148   :  { %v119_v22 = vpop.eup %118  ;;  %v59_v23 = vsel %vm57_vm2, %v58_v20, %v56_v21 }
 0x149   :  { %v67_v24 = vadd.f32 1e-06, %v59_v23  ;;  %v61_v25 = vmul.f32 %v119_v22, %v52_v17 }
 0x14b   :  { %120 = vrcp.f32 %v67_v24  ;;  %v63_v27 = vsel %vm62_vm3, %v52_v17, %v61_v25 }
 0x14c   :  { %v66_v28 = vsel %vm64_vm4, %v65_v26, %v63_v27 }
 0x14d   :  { %v68_v29 = vadd.f32 1e-06, %v66_v28 }
 0x14f   :  { %122 = vrcp.f32 %v68_v29 }
 0x155   :  { %v121_v30 = vpop.eup %120 }
 0x156   :  { %v72_v32 = vmul.f32 %v121_v30, %v41_v6 }
 0x158   :  { %v80_v34 = vmul.f32 %v110_v31, %v72_v32 }
 0x159   :  { %v123_v35 = vpop.eup %122 }
 0x15a   :  { %v73_v36 = vmul.f32 %v123_v35, %v42_v10  ;;  %v89_v37 = vadd.f32 %v111_v33, %v80_v34 }
 0x15c   :  { %v81_v38 = vmul.f32 %v110_v31, %v73_v36  ;;  %91 = vst.msk [vmem:[#allocation5] sm:$0xff] %vm31_vm0, %v89_v37 }
 0x15e   :  { %v90_v39 = vadd.f32 %v111_v33, %v81_v38 }
 0x160   :  { %92 = vst.msk [vmem:[#allocation5 + $0x8] sm:$0xff] %vm31_vm0, %v90_v39 }
 0x161   :  { %157 = shalt.err (!%p154_p12)
}
 0x162   :  { %s158_s5 = scalar_lea.hbm %s241_s3, 256 }
 0x163   :  { %p159_p13 = scmp.ne.s32.totalorder %s241_s3, %s158_s5  ;;  %p162_p0 = scmp.lt.u32.totalorder %s158_s5, %s241_s3 }
 0x165   :  { %p164_p1 = pnand %p162_p0, %p159_p13 }
 0x167   :  { %167 = shalt.err (!%p164_p1)
}
 0x168   :  { %104 = dma.vmem_to_hbm [thread:$0]  %s99_s30, 256, %s241_s3, [#allocation4], %s173_s22, %s173_s22, %s174_s23  }
 0x169   :  { %170 = dma.done.wait [#allocation4], 256  }
 0x16a   :  { %171 = vsyncadd [#allocation4], 4294967040 }
 0x16b   :  { %108 = vsyncpa [#allocation3], 1 }
 0x16c   :  { %109 = vsyncpa [#allocation4], 1 }

</bundles_post_ra>
